<compile_context>
chip_gen: v5e
topology: v5e:2x2
jax: 0.10.0
libtpu: 0.0.40
codegen_flags: <defaults>
</compile_context>

<pallas_src>
import jax
import jax.numpy as jnp
from jax.experimental import pallas as pl
from jax.experimental.pallas import tpu as pltpu

LN_EPS = 1e-5


def ffn_kernel(x_ref, w1_ref, b1_ref, w2_ref, b2_ref, gamma_ref, beta_ref,
               o_ref, acc_ref):
    f = pl.program_id(1)
    nf = pl.num_programs(1)

    @pl.when(f == 0)
    def _():
        acc_ref[...] = jnp.zeros_like(acc_ref)

    # linear1 (+bias) + relu on this F tile: matmul in the input dtype,
    # f32 accumulation on the MXU.
    x = x_ref[...]                                                     # (tm, D)
    h = jnp.dot(x, w1_ref[...], preferred_element_type=jnp.float32)    # (tm, tf)
    h = jnp.maximum(h + b1_ref[...].astype(jnp.float32), 0.0)

    # dropout: identity in eval mode.

    # partial linear2 for this F tile, accumulated in f32 VMEM scratch.
    acc_ref[...] += jnp.dot(h.astype(w2_ref.dtype), w2_ref[...],
                            preferred_element_type=jnp.float32)        # (tm, D)

    @pl.when(f == nf - 1)
    def _():
        # bias + residual + layernorm over the feature dim, in f32.
        z = acc_ref[...] + b2_ref[...].astype(jnp.float32) + x.astype(jnp.float32)
        mean = jnp.mean(z, axis=-1, keepdims=True)
        zc = z - mean
        var = jnp.mean(zc * zc, axis=-1, keepdims=True)
        rstd = jax.lax.rsqrt(var + LN_EPS)                             # EUP slot
        out = (zc * rstd) * gamma_ref[...].astype(jnp.float32) \
              + beta_ref[...].astype(jnp.float32)
        o_ref[...] = out.astype(o_ref.dtype)


def _round_up(x, m):
    return ((x + m - 1) // m) * m


def _choose_ff_tile(d_model, d_ff, itemsize, budget_bytes):
    """Largest F tile whose double-buffered w1+w2 blocks fit the VMEM budget.

    Full d_ff when possible (weights then stay resident across the row grid
    and are DMA'd from HBM exactly once)."""
    full_bytes = 2 * 2 * d_model * d_ff * itemsize       # w1 + w2, 2-deep
    if full_bytes <= budget_bytes:
        return d_ff
    tf = budget_bytes // (4 * d_model * itemsize)
    tf = max(128, (tf // 128) * 128)                     # keep (·,128) divisibility
    return min(tf, d_ff)


def feed_forward_sublayer(x, w1, b1, w2, b2, gamma, beta, *,
                          tile_rows=256, weight_vmem_budget=20 << 20):
    """x: (batch, seq, d_model) -> (batch, seq, d_model)."""
    B, S, D = x.shape
    F = w1.shape[1]
    R = B * S
    itemsize = jnp.dtype(x.dtype).itemsize

    # Row-tile size: large (MXU-filling) but never larger than the (padded)
    # row count; bf16 needs a 16-row sublane minimum, f32 needs 8.
    sublane = 16 if x.dtype == jnp.dtype(jnp.bfloat16) else 8
    tm = min(tile_rows, _round_up(R, sublane))
    Rp = _round_up(R, tm)

    # F-tile size: full F when the weights fit in VMEM, otherwise tiled.
    tf = _choose_ff_tile(D, F, itemsize, weight_vmem_budget)
    Fp = _round_up(F, tf)

    x2d = x.reshape(R, D)
    if Rp != R:
        x2d = jnp.pad(x2d, ((0, Rp - R), (0, 0)))
    if Fp != F:
        # Zero-padding is exact: relu(x@0 + 0) = 0 and 0 @ w2_pad = 0.
        w1 = jnp.pad(w1, ((0, 0), (0, Fp - F)))
        b1 = jnp.pad(b1, ((0, Fp - F),))
        w2 = jnp.pad(w2, ((0, Fp - F), (0, 0)))

    # Biases / layernorm params as (1, dim) rows so they broadcast in-kernel.
    b1r = b1.reshape(1, Fp)
    b2r = b2.reshape(1, D)
    gr = gamma.reshape(1, D)
    br = beta.reshape(1, D)

    grid = (Rp // tm, Fp // tf)

    # Advisory cost estimate for XLA scheduling around this custom call.
    cost = pl.CostEstimate(
        flops=4 * Rp * D * Fp,                    # two matmuls
        transcendentals=Rp,                       # rsqrt per row
        bytes_accessed=(x2d.size + w1.size + w2.size + Rp * D) * itemsize,
    )

    # Rough per-call VMEM footprint (double-buffered inputs + output + f32 acc).
    tile_bytes = (
        2 * (tm * D + D * tf + tf + tf * D + 3 * D) * itemsize   # inputs, 2-deep
        + 2 * tm * D * itemsize                                  # output, 2-deep
        + tm * D * 4                                             # f32 accumulator
    )
    cp_kwargs = dict(dimension_semantics=("parallel", "arbitrary"))
    if tile_bytes > (32 << 20):
        # Only raise above the default scoped limit when actually needed;
        # stay below v7x's 64 MiB physical VMEM.
        cp_kwargs["vmem_limit_bytes"] = min(int(tile_bytes * 3 // 2), 56 << 20)

    out2d = pl.pallas_call(
        ffn_kernel,
        out_shape=jax.ShapeDtypeStruct((Rp, D), x.dtype),
        grid_spec=pltpu.PrefetchScalarGridSpec(
            num_scalar_prefetch=0,
            grid=grid,
            in_specs=[
                pl.BlockSpec((tm, D), lambda i, f: (i, 0)),    # x rows (const over f)
                pl.BlockSpec((D, tf), lambda i, f: (0, f)),    # w1 F-tile
                pl.BlockSpec((1, tf), lambda i, f: (0, f)),    # b1 F-tile
                pl.BlockSpec((tf, D), lambda i, f: (f, 0)),    # w2 F-tile
                pl.BlockSpec((1, D), lambda i, f: (0, 0)),     # b2
                pl.BlockSpec((1, D), lambda i, f: (0, 0)),     # gamma
                pl.BlockSpec((1, D), lambda i, f: (0, 0)),     # beta
            ],
            out_specs=pl.BlockSpec((tm, D), lambda i, f: (i, 0)),
            scratch_shapes=[pltpu.VMEM((tm, D), jnp.float32)],  # linear2 accumulator
        ),
        compiler_params=pltpu.CompilerParams(**cp_kwargs),
        cost_estimate=cost,
    )(x2d, w1, b1r, w2, b2r, gr, br)

    return out2d[:R].reshape(B, S, D)


def init_params(key, d_model, dim_feedforward, dtype=jnp.float32):
    """Deterministic init mirroring nn.Linear / nn.LayerNorm parameter shapes."""
    k1, k2, k3, k4 = jax.random.split(key, 4)
    lim1 = 1.0 / jnp.sqrt(d_model)
    lim2 = 1.0 / jnp.sqrt(dim_feedforward)
    # Stored transposed relative to torch (in_features, out_features) for x @ W.
    w1 = jax.random.uniform(k1, (d_model, dim_feedforward), dtype, -lim1, lim1)
    b1 = jax.random.uniform(k2, (dim_feedforward,), dtype, -lim1, lim1)
    w2 = jax.random.uniform(k3, (dim_feedforward, d_model), dtype, -lim2, lim2)
    b2 = jax.random.uniform(k4, (d_model,), dtype, -lim2, lim2)
    gamma = jnp.ones((d_model,), dtype)
    beta = jnp.zeros((d_model,), dtype)
    return w1, b1, w2, b2, gamma, beta


def reference(x, w1, b1, w2, b2, gamma, beta):
    h = jnp.maximum(x @ w1 + b1, 0.0)
    y = h @ w2 + b2
    z = y + x
    mean = jnp.mean(z, axis=-1, keepdims=True)
    var = jnp.mean((z - mean) ** 2, axis=-1, keepdims=True)
    return ((z - mean) / jnp.sqrt(var + LN_EPS)) * gamma + beta


if __name__ == "__main__":
    batch, seq, d_model, d_ff = 2, 8, 32, 128

    key = jax.random.PRNGKey(0)
    kx, kp = jax.random.split(key)
    x = jax.random.normal(kx, (batch, seq, d_model), jnp.float32)
    w1, b1, w2, b2, gamma, beta = init_params(kp, d_model, d_ff)

    out = feed_forward_sublayer(x, w1, b1, w2, b2, gamma, beta)
    out = jax.block_until_ready(out)

    ref = reference(x, w1, b1, w2, b2, gamma, beta)
    assert out.shape == x.shape
    assert jnp.allclose(out, ref, atol=1e-4, rtol=1e-4), "mismatch vs JAX reference"

    print("KERNEL_OK")
</pallas_src>

<mosaic_0001>
module attributes {stable_mosaic.version = 11 : i64} {
  func.func @ffn_kernel(%arg0: i32, %arg1: i32, %arg2: memref<16x32xf32, #tpu.memory_space<vmem>>, %arg3: memref<32x128xf32, #tpu.memory_space<vmem>>, %arg4: memref<1x128xf32, #tpu.memory_space<vmem>>, %arg5: memref<128x32xf32, #tpu.memory_space<vmem>>, %arg6: memref<1x32xf32, #tpu.memory_space<vmem>>, %arg7: memref<1x32xf32, #tpu.memory_space<vmem>>, %arg8: memref<1x32xf32, #tpu.memory_space<vmem>>, %arg9: memref<16x32xf32, #tpu.memory_space<vmem>>, %arg10: memref<16x32xf32, #tpu.memory_space<vmem>>) attributes {dimension_semantics = [#tpu.dimension_semantics<parallel>, #tpu.dimension_semantics<arbitrary>], iteration_bounds = array<i64: 1, 1>, scalar_prefetch = 0 : i64, scratch_operands = 1 : i64, tpu.core_type = #tpu.core_type<tc>, window_params = [{transform_indices = @transform_0, window_bounds = array<i64: 16, 32>}, {transform_indices = @transform_1, window_bounds = array<i64: 32, 128>}, {transform_indices = @transform_2, window_bounds = array<i64: 1, 128>}, {transform_indices = @transform_3, window_bounds = array<i64: 128, 32>}, {pipeline_mode = #tpu.pipeline_mode<synchronous>, transform_indices = @transform_4, window_bounds = array<i64: 1, 32>}, {pipeline_mode = #tpu.pipeline_mode<synchronous>, transform_indices = @transform_5, window_bounds = array<i64: 1, 32>}, {pipeline_mode = #tpu.pipeline_mode<synchronous>, transform_indices = @transform_6, window_bounds = array<i64: 1, 32>}, {transform_indices = @transform_7, window_bounds = array<i64: 16, 32>}]} {
    %c0_i32 = arith.constant 0 : i32
    %0 = arith.cmpi eq, %arg1, %c0_i32 : i32
    %1 = arith.extui %0 : i1 to i32
    %c0_i32_0 = arith.constant 0 : i32
    %2 = arith.cmpi ne, %1, %c0_i32_0 : i32
    scf.if %2 {
      %cst_16 = arith.constant 0.000000e+00 : f32
      %19 = vector.broadcast %cst_16 : f32 to vector<16x32xf32>
      %c0_17 = arith.constant 0 : index
      %c0_18 = arith.constant 0 : index
      %20 = vector.load %arg10[%c0_17, %c0_18] : memref<16x32xf32, #tpu.memory_space<vmem>>, vector<16x32xf32>
      tpu.vector_store %arg10[%c0_17, %c0_18], %19 {strides = array<i32>} : memref<16x32xf32, #tpu.memory_space<vmem>>, vector<16x32xf32>,
    } else {
    }
    %c0 = arith.constant 0 : index
    %c0_1 = arith.constant 0 : index
    %3 = vector.load %arg2[%c0, %c0_1] : memref<16x32xf32, #tpu.memory_space<vmem>>, vector<16x32xf32>
    %c0_2 = arith.constant 0 : index
    %c0_3 = arith.constant 0 : index
    %4 = vector.load %arg3[%c0_2, %c0_3] : memref<32x128xf32, #tpu.memory_space<vmem>>, vector<32x128xf32>
    %cst = arith.constant dense<0.000000e+00> : vector<16x128xf32>
    %5 = tpu.matmul %3, %4, %cst {dimension_numbers = #tpu.dot_dimension_numbers<[1], [0], [0], [1], [0, 0, 1, 1], [], []>} : vector<16x32xf32>, vector<32x128xf32>, vector<16x128xf32> -> vector<16x128xf32>
    %c0_4 = arith.constant 0 : index
    %c0_5 = arith.constant 0 : index
    %6 = vector.load %arg4[%c0_4, %c0_5] : memref<1x128xf32, #tpu.memory_space<vmem>>, vector<1x128xf32>
    %7 = vector.broadcast %6 : vector<1x128xf32> to vector<16x128xf32>
    %8 = arith.addf %5, %7 : vector<16x128xf32>
    %cst_6 = arith.constant 0.000000e+00 : f32
    %9 = vector.broadcast %cst_6 : f32 to vector<16x128xf32>
    %10 = arith.maximumf %8, %9 : vector<16x128xf32>
    %c0_7 = arith.constant 0 : index
    %c0_8 = arith.constant 0 : index
    %11 = vector.load %arg10[%c0_7, %c0_8] : memref<16x32xf32, #tpu.memory_space<vmem>>, vector<16x32xf32>
    %c0_9 = arith.constant 0 : index
    %c0_10 = arith.constant 0 : index
    %12 = vector.load %arg5[%c0_9, %c0_10] : memref<128x32xf32, #tpu.memory_space<vmem>>, vector<128x32xf32>
    %cst_11 = arith.constant dense<0.000000e+00> : vector<16x32xf32>
    %13 = tpu.matmul %10, %12, %cst_11 {dimension_numbers = #tpu.dot_dimension_numbers<[1], [0], [0], [1], [0, 0, 1, 1], [], []>} : vector<16x128xf32>, vector<128x32xf32>, vector<16x32xf32> -> vector<16x32xf32>
    %14 = arith.addf %11, %13 : vector<16x32xf32>
    %c0_12 = arith.constant 0 : index
    %c0_13 = arith.constant 0 : index
    %15 = vector.load %arg10[%c0_12, %c0_13] : memref<16x32xf32, #tpu.memory_space<vmem>>, vector<16x32xf32>
    tpu.vector_store %arg10[%c0_12, %c0_13], %14 {strides = array<i32>} : memref<16x32xf32, #tpu.memory_space<vmem>>, vector<16x32xf32>,
    %c0_i32_14 = arith.constant 0 : i32
    %16 = arith.cmpi eq, %arg1, %c0_i32_14 : i32
    %17 = arith.extui %16 : i1 to i32
    %c0_i32_15 = arith.constant 0 : i32
    %18 = arith.cmpi ne, %17, %c0_i32_15 : i32
    scf.if %18 {
      %c0_16 = arith.constant 0 : index
      %c0_17 = arith.constant 0 : index
      %19 = vector.load %arg10[%c0_16, %c0_17] : memref<16x32xf32, #tpu.memory_space<vmem>>, vector<16x32xf32>
      %c0_18 = arith.constant 0 : index
      %c0_19 = arith.constant 0 : index
      %20 = vector.load %arg6[%c0_18, %c0_19] : memref<1x32xf32, #tpu.memory_space<vmem>>, vector<1x32xf32>
      %21 = vector.broadcast %20 : vector<1x32xf32> to vector<16x32xf32>
      %22 = arith.addf %19, %21 : vector<16x32xf32>
      %23 = arith.addf %22, %3 : vector<16x32xf32>
      %cst_20 = arith.constant dense<0.000000e+00> : vector<16xf32>
      %24 = vector.multi_reduction <add>, %23, %cst_20 [1] : vector<16x32xf32> to vector<16xf32>
      %25 = vector.shape_cast %24 : vector<16xf32> to vector<16x1xf32>
      %cst_21 = arith.constant 3.200000e+01 : f32
      %26 = vector.broadcast %cst_21 : f32 to vector<16x1xf32>
      %27 = arith.divf %25, %26 : vector<16x1xf32>
      %28 = vector.broadcast %27 : vector<16x1xf32> to vector<16x32xf32>
      %29 = arith.subf %23, %28 : vector<16x32xf32>
      %30 = arith.mulf %29, %29 : vector<16x32xf32>
      %cst_22 = arith.constant dense<0.000000e+00> : vector<16xf32>
      %31 = vector.multi_reduction <add>, %30, %cst_22 [1] : vector<16x32xf32> to vector<16xf32>
      %32 = vector.shape_cast %31 : vector<16xf32> to vector<16x1xf32>
      %cst_23 = arith.constant 3.200000e+01 : f32
      %33 = vector.broadcast %cst_23 : f32 to vector<16x1xf32>
      %34 = arith.divf %32, %33 : vector<16x1xf32>
      %cst_24 = arith.constant 9.99999974E-6 : f32
      %35 = vector.broadcast %cst_24 : f32 to vector<16x1xf32>
      %36 = arith.addf %34, %35 : vector<16x1xf32>
      %37 = math.rsqrt %36 : vector<16x1xf32>
      %38 = vector.broadcast %37 : vector<16x1xf32> to vector<16x32xf32>
      %39 = arith.mulf %29, %38 : vector<16x32xf32>
      %c0_25 = arith.constant 0 : index
      %c0_26 = arith.constant 0 : index
      %40 = vector.load %arg7[%c0_25, %c0_26] : memref<1x32xf32, #tpu.memory_space<vmem>>, vector<1x32xf32>
      %41 = vector.broadcast %40 : vector<1x32xf32> to vector<16x32xf32>
      %42 = arith.mulf %39, %41 : vector<16x32xf32>
      %c0_27 = arith.constant 0 : index
      %c0_28 = arith.constant 0 : index
      %43 = vector.load %arg8[%c0_27, %c0_28] : memref<1x32xf32, #tpu.memory_space<vmem>>, vector<1x32xf32>
      %44 = vector.broadcast %43 : vector<1x32xf32> to vector<16x32xf32>
      %45 = arith.addf %42, %44 : vector<16x32xf32>
      %c0_29 = arith.constant 0 : index
      %c0_30 = arith.constant 0 : index
      %46 = vector.load %arg9[%c0_29, %c0_30] : memref<16x32xf32, #tpu.memory_space<vmem>>, vector<16x32xf32>
      tpu.vector_store %arg9[%c0_29, %c0_30], %45 {strides = array<i32>} : memref<16x32xf32, #tpu.memory_space<vmem>>, vector<16x32xf32>,
    } else {
    }
    return
  }
  func.func @transform_0(%arg0: i32, %arg1: i32) -> (i32, i32) {
    %c0_i32 = arith.constant 0 : i32
    %c0_i32_0 = arith.constant 0 : i32
    return %arg0, %c0_i32 : i32, i32
  }
  func.func @transform_1(%arg0: i32, %arg1: i32) -> (i32, i32) {
    %c0_i32 = arith.constant 0 : i32
    %c0_i32_0 = arith.constant 0 : i32
    return %c0_i32, %arg1 : i32, i32
  }
  func.func @transform_2(%arg0: i32, %arg1: i32) -> (i32, i32) {
    %c0_i32 = arith.constant 0 : i32
    %c0_i32_0 = arith.constant 0 : i32
    return %c0_i32, %arg1 : i32, i32
  }
  func.func @transform_3(%arg0: i32, %arg1: i32) -> (i32, i32) {
    %c0_i32 = arith.constant 0 : i32
    %c0_i32_0 = arith.constant 0 : i32
    return %arg1, %c0_i32 : i32, i32
  }
  func.func @transform_4(%arg0: i32, %arg1: i32) -> (i32, i32) {
    %c0_i32 = arith.constant 0 : i32
    %c0_i32_0 = arith.constant 0 : i32
    %c0_i32_1 = arith.constant 0 : i32
    return %c0_i32, %c0_i32_0 : i32, i32
  }
  func.func @transform_5(%arg0: i32, %arg1: i32) -> (i32, i32) {
    %c0_i32 = arith.constant 0 : i32
    %c0_i32_0 = arith.constant 0 : i32
    %c0_i32_1 = arith.constant 0 : i32
    return %c0_i32, %c0_i32_0 : i32, i32
  }
  func.func @transform_6(%arg0: i32, %arg1: i32) -> (i32, i32) {
    %c0_i32 = arith.constant 0 : i32
    %c0_i32_0 = arith.constant 0 : i32
    %c0_i32_1 = arith.constant 0 : i32
    return %c0_i32, %c0_i32_0 : i32, i32
  }
  func.func @transform_7(%arg0: i32, %arg1: i32) -> (i32, i32) {
    %c0_i32 = arith.constant 0 : i32
    %c0_i32_0 = arith.constant 0 : i32
    return %arg0, %c0_i32 : i32, i32
  }
}

</mosaic_0001>

<bundles_post_ra>
// kernel: tpu_custom_call.1
= control target key start
LH: loop header
LB: loop body
LE: loop exit
PB: predicated region body
PF: predicated region fallthrough
CT: control target
= control target key end

     0   :  { %vm31_vm0 = vcmask 261120   ;;  %s418_s0 = inlined_call_operand.vmem [shape: f32[16,32], index: 0, kind: input, shape index: {}]   ;;  %s419_s1 = inlined_call_operand.vmem [shape: f32[32,128], index: 1, kind: input, shape index: {}]   ;;  %s420_s2 = inlined_call_operand.vmem [shape: f32[1,128], index: 2, kind: input, shape index: {}]   ;;  %s421_s3 = inlined_call_operand.vmem [shape: f32[128,32], index: 3, kind: input, shape index: {}]   ;;  %s422_s4 = inlined_call_operand.vmem [shape: f32[1,32], index: 4, kind: input, shape index: {}]   ;;  %s423_s5 = inlined_call_operand.vmem [shape: f32[1,32], index: 5, kind: input, shape index: {}]   ;;  %s424_s6 = inlined_call_operand.vmem [shape: f32[1,32], index: 6, kind: input, shape index: {}]   ;;  %s425_s7 = inlined_call_operand.hbm [shape: f32[16,32], index: 7, kind: output, shape index: {}]  }
   0x1   :  { %v39_v0 = vld [vmem:[%s419_s1 + $0x18] sm:$0xff]  ;;  %v38_v1 = vld [vmem:[%s419_s1 + $0x10] sm:$0xff]  ;;  %v37_v2 = vld [vmem:[%s419_s1 + $0x8] sm:$0xff] }
   0x2   :  { %63 = vmatpush.msra.mxu0 %v39_v0  ;;  %v93_v3 = vld [vmem:[%s421_s3 + $0x78] sm:$0xff]  ;;  %v92_v4 = vld [vmem:[%s421_s3 + $0x70] sm:$0xff]  ;;  %v36_v5 = vld [vmem:[%s419_s1] sm:$0xff] }
   0x3   :  { %94 = vmatpush.msra.mxu1 %v93_v3  ;;  %v91_v6 = vld [vmem:[%s421_s3 + $0x68] sm:$0xff]  ;;  %219 = vmatpush.msra.mxu2 %v93_v3  ;;  %v345_v7 = vld [vmem:[%s418_s0] sm:$0xff] }
   0x4   :  { %64 = vmatpush.msra.mxu0 %v38_v1  ;;  %v90_v8 = vld [vmem:[%s421_s3 + $0x60] sm:$0xff] }
   0x5   :  { %95 = vmatpush.msra.mxu1 %v92_v4  ;;  %220 = vmatpush.msra.mxu2 %v92_v4 }
   0x6   :  { %65 = vmatpush.msra.mxu0 %v37_v2 }
   0x7   :  { %96 = vmatpush.msra.mxu1 %v91_v6 }
   0x8   :  { %66 = vmatpush.msra.mxu0 %v36_v5 }
   0x9   :  { %12 = vsyncpa [#allocation4], 0  ;;  %217 = vmatmul.msk.f32.vlgmr.msra.gmra.mxu0 %vm31_vm0, %v345_v7  ;;  %v89_v9 = vld [vmem:[%s421_s3 + $0x58] sm:$0xff]  ;;  %221 = vmatpush.msra.mxu2 %v91_v6  ;;  %v88_v10 = vld [vmem:[%s421_s3 + $0x50] sm:$0xff]  ;;  %v276_v22 = vmov 0.0   ;;  %v277_v45 = vmov 32.0  }
   0xa   :  { %97 = vmatpush.msra.mxu1 %v90_v8  ;;  %v87_v11 = vld [vmem:[%s421_s3 + $0x48] sm:$0xff]  ;;  %v86_v13 = vld [vmem:[%s421_s3 + $0x40] sm:$0xff]  ;;  %v85_v14 = vld [vmem:[%s421_s3 + $0x38] sm:$0xff]  ;;  %32 = vst.msk [vmem:[#allocation2] sm:$0xff] %vm31_vm0, %v276_v22  ;;  %244 = vrcp.f32 %v277_v45  ;;  %s279_s27 = smov 128   ;;  %s280_s28 = smov 8  }
   0xb   :  { %222 = vmatpush.msra.mxu2 %v90_v8  ;;  %v35_v12 = vld [vmem:[%s418_s0 + $0x8] sm:$0xff]  ;;  %v84_v15 = vld [vmem:[%s421_s3 + $0x30] sm:$0xff]  ;;  %v82_v17 = vld [vmem:[%s421_s3 + $0x20] sm:$0xff]  ;;  %33 = vst.msk [vmem:[#allocation2 + $0x8] sm:$0xff] %vm31_vm0, %v276_v22 }
   0xc   :  { %98 = vmatpush.msra.mxu1 %v89_v9  ;;  %v83_v16 = vld [vmem:[%s421_s3 + $0x28] sm:$0xff]  ;;  %v81_v18 = vld [vmem:[%s421_s3 + $0x18] sm:$0xff]  ;;  %v80_v19 = vld [vmem:[%s421_s3 + $0x10] sm:$0xff] }
   0xd   :  { %223 = vmatpush.msra.mxu2 %v89_v9  ;;  %v79_v20 = vld [vmem:[%s421_s3 + $0x8] sm:$0xff]  ;;  %v78_v21 = vld [vmem:[%s421_s3] sm:$0xff] }
   0xe   :  { %99 = vmatpush.msra.mxu1 %v88_v10  ;;  %v240_v23 = vld [vmem:[%s420_s2] ss:$0 sm:$0xff] }
   0xf   :  { %224 = vmatpush.msra.mxu2 %v88_v10  ;;  %v241_v33 = vld [vmem:[%s422_s4] ss:$0 sm:$0xff] }
  0x10   :  { %100 = vmatpush.msra.mxu1 %v87_v11  ;;  %v245_v46 = vpop.eup %244  ;;  %v242_v10 = vld [vmem:[%s423_s5] ss:$0 sm:$0xff]  ;;  %s278_s5 = smov [#allocation3]  }
  0x11   :  { %218 = vmatmul.msk.f32.gmra.mxu0 %vm31_vm0, %v35_v12  ;;  %225 = vmatpush.msra.mxu2 %v87_v11  ;;  %v76_v30 = vld [vmem:[#allocation2] sm:$0xff]  ;;  %v141_v47 = vmul.f32 32.0, %v245_v46  ;;  %vm145_vm1 = vweird.f32 %v245_v46  ;;  %s203_s24 = sshll.u32 %s278_s5, 4  ;;  %s204_s24 = int_to_ptr.vmem [resolvable:$true] %s203_s24 }
  0x12   :  { %101 = vmatpush.msra.mxu1 %v86_v13  ;;  %v77_v36 = vld [vmem:[#allocation2 + $0x8] sm:$0xff] }
  0x13   :  { %226 = vmatpush.msra.mxu2 %v86_v13  ;;  %v142_v48 = vsub.f32 1.0, %v141_v47  ;;  %v243_v13 = vld [vmem:[%s424_s6] ss:$0 sm:$0xff]  ;;  %s205_s6 = sshll.u32 %s425_s7, 4  ;;  %s206_s6 = int_to_ptr.hbm [resolvable:$true] %s205_s6 }
  0x14   :  { %102 = vmatpush.msra.mxu1 %v85_v14 }
  0x15   :  { %227 = vmatpush.msra.mxu2 %v85_v14  ;;  %v143_v49 = vmul.f32 %v245_v46, %v142_v48 }
  0x16   :  { %103 = vmatpush.msra.mxu1 %v84_v15 }
  0x17   :  { %228 = vmatpush.msra.mxu2 %v84_v15  ;;  %v144_v50 = vadd.f32 %v245_v46, %v143_v49 }
  0x18   :  { %104 = vmatpush.msra.mxu1 %v83_v16 }
  0x19   :  { %229 = vmatpush.msra.mxu2 %v83_v16  ;;  %v146_v51 = vsel %vm145_vm1, %v245_v46, %v144_v50 }
  0x1a   :  { %105 = vmatpush.msra.mxu1 %v82_v17 }
  0x1b   :  { %230 = vmatpush.msra.mxu2 %v82_v17 }
  0x1c   :  { %106 = vmatpush.msra.mxu1 %v81_v18 }
  0x1d   :  { %231 = vmatpush.msra.mxu2 %v81_v18 }
  0x1e   :  { %107 = vmatpush.msra.mxu1 %v80_v19 }
  0x1f   :  { %232 = vmatpush.msra.mxu2 %v80_v19 }
  0x20   :  { %108 = vmatpush.msra.mxu1 %v79_v20 }
  0x21   :  { %233 = vmatpush.msra.mxu2 %v79_v20 }
  0x22   :  { %109 = vmatpush.msra.mxu1 %v78_v21 }
  0x23   :  { %234 = vmatpush.msra.mxu2 %v78_v21 }
  0x86   :  { %v68_v24 = vpop.f32.mrf.mxu0 }
  0x87   :  { %v69_v25 = vadd.f32 %v240_v23, %v68_v24 }
  0x89   :  { %v74_v26 = vmax.f32 %v69_v25, 0.0 }
  0x8b   :  { %110 = vmatmul.f32.vlgmr.msra.gmra.mxu1 %v74_v26 }
  0x8e   :  { %v71_v27 = vpop.f32.mrf.mxu0 }
  0x8f   :  { %v72_v28 = vadd.f32 %v240_v23, %v71_v27 }
  0x91   :  { %v75_v29 = vmax.f32 %v72_v28, 0.0 }
  0x93   :  { %113 = vmatmul.f32.vlgmr.msra.gmra.mxu2 %v75_v29 }
 0x108   :  { %v111_v31 = vpop.f32.mrf.mxu1 }
 0x109   :  { %v117_v32 = vadd.f32 %v111_v31, %v76_v30 }
 0x10b   :  { %119 = vst.msk [vmem:[#allocation2] sm:$0xff] %vm31_vm0, %v117_v32 }
 0x112   :  { %v124_v34 = vld [vmem:[#allocation2] sm:$0xff] }
 0x113   :  { %v130_v35 = vadd.f32 %v241_v33, %v124_v34 }
 0x115   :  { %v132_v37 = vadd.f32 %v130_v35, %v345_v7 }
 0x116   :  { %v114_v38 = vpop.f32.mrf.mxu2 }
 0x117   :  { %v118_v39 = vadd.f32 %v114_v38, %v77_v36  ;;  %v134_v40 = vsel %vm31_vm0, %v132_v37, 0.0 }
 0x118   :  { %135 = vadd.xlane.f32.xlu0 %v134_v40 }
 0x119   :  { %120 = vst.msk [vmem:[#allocation2 + $0x8] sm:$0xff] %vm31_vm0, %v118_v39 }
 0x120   :  { %v125_v41 = vld [vmem:[#allocation2 + $0x8] sm:$0xff] }
 0x121   :  { %v131_v42 = vadd.f32 %v241_v33, %v125_v41 }
 0x123   :  { %v133_v43 = vadd.f32 %v131_v42, %v35_v12 }
 0x125   :  { %v137_v44 = vsel %vm31_vm0, %v133_v43, 0.0 }
 0x126   :  { %138 = vadd.xlane.f32.xlu0 %v137_v44 }
 0x18b   :  { %v136_v52 = vpop.xlane.xlu0 %135 }
 0x18c   :  { %v147_v53 = vmul.f32 %v146_v51, %v136_v52 }
 0x18e   :  { %v149_v54 = vsub.f32 %v132_v37, %v147_v53 }
 0x190   :  { %v151_v55 = vmul.f32 %v149_v54, %v149_v54 }
 0x192   :  { %v153_v56 = vsel %vm31_vm0, %v151_v55, 0.0 }
 0x193   :  { %154 = vadd.xlane.f32.xlu1 %v153_v56 }
 0x199   :  { %v139_v57 = vpop.xlane.xlu0 %138 }
 0x19a   :  { %v148_v58 = vmul.f32 %v146_v51, %v139_v57 }
 0x19c   :  { %v150_v59 = vsub.f32 %v133_v43, %v148_v58 }
 0x19e   :  { %v152_v60 = vmul.f32 %v150_v59, %v150_v59 }
 0x1a0   :  { %v156_v61 = vsel %vm31_vm0, %v152_v60, 0.0 }
 0x1a1   :  { %157 = vadd.xlane.f32.xlu1 %v156_v61 }
 0x206   :  { %v155_v62 = vpop.xlane.xlu1 %154 }
 0x207   :  { %v159_v63 = vmul.f32 %v155_v62, %v146_v51 }
 0x209   :  { %v161_v0 = vadd.f32 1e-05, %v159_v63 }
 0x20b   :  { %246 = vrsqrt.f32 %v161_v0  ;;  %vm169_vm3 = vweird.f32 %v161_v0 }
 0x211   :  { %v247_v1 = vpop.eup %246 }
 0x212   :  { %v164_v2 = vmul.f32 %v247_v1, %v161_v0  ;;  %vm170_vm2 = vweird.f32 %v247_v1 }
 0x213   :  { %vm171_vm4 = vmor %vm169_vm3, %vm170_vm2 }
 0x214   :  { %v165_v3 = vmul.f32 %v247_v1, %v164_v2  ;;  %v158_v4 = vpop.xlane.xlu1 %157 }
 0x215   :  { %v160_v5 = vmul.f32 %v158_v4, %v146_v51 }
 0x216   :  { %v166_v6 = vmul.f32 0.5, %v165_v3 }
 0x217   :  { %v162_v7 = vadd.f32 1e-05, %v160_v5 }
 0x218   :  { %v167_v8 = vsub.f32 1.5, %v166_v6 }
 0x219   :  { %248 = vrsqrt.f32 %v162_v7  ;;  %vm179_vm6 = vweird.f32 %v162_v7 }
 0x21a   :  { %v168_v9 = vmul.f32 %v247_v1, %v167_v8 }
 0x21c   :  { %v172_v11 = vsel %vm171_vm4, %v247_v1, %v168_v9 }
 0x21d   :  { %v183_v12 = vmul.f32 %v172_v11, %v149_v54 }
 0x21f   :  { %v249_v14 = vpop.eup %248  ;;  %v189_v15 = vmul.f32 %v242_v10, %v183_v12 }
 0x220   :  { %v174_v16 = vmul.f32 %v249_v14, %v162_v7  ;;  %vm180_vm5 = vweird.f32 %v249_v14 }
 0x221   :  { %v195_v17 = vadd.f32 %v243_v13, %v189_v15  ;;  %vm181_vm7 = vmor %vm179_vm6, %vm180_vm5 }
 0x222   :  { %v175_v18 = vmul.f32 %v249_v14, %v174_v16 }
 0x223   :  { %197 = vst.msk [vmem:[#allocation3] sm:$0xff] %vm31_vm0, %v195_v17 }
 0x224   :  { %v176_v19 = vmul.f32 0.5, %v175_v18 }
 0x226   :  { %v177_v20 = vsub.f32 1.5, %v176_v19 }
 0x228   :  { %v178_v21 = vmul.f32 %v249_v14, %v177_v20 }
 0x22a   :  { %v182_v22 = vsel %vm181_vm7, %v249_v14, %v178_v21 }
 0x22b   :  { %v184_v23 = vmul.f32 %v182_v22, %v150_v59 }
 0x22d   :  { %v190_v24 = vmul.f32 %v242_v10, %v184_v23 }
 0x22f   :  { %v196_v25 = vadd.f32 %v243_v13, %v190_v24 }
 0x231   :  { %198 = vst.msk [vmem:[#allocation3 + $0x8] sm:$0xff] %vm31_vm0, %v196_v25 }
 0x232   :  { %211 = dma.vmem_to_hbm [thread:$0]  %s204_s24, 256, %s206_s6, [#allocation4], %s279_s27, %s279_s27, %s280_s28  }
 0x233   :  { %274 = dma.done.wait [#allocation4], 256  }
 0x234   :  { %275 = vsyncadd [#allocation4], 4294967040 }
 0x235   :  { %216 = vsyncpa [#allocation4], 1 }

</bundles_post_ra>
